<compile_context>
chip_gen: v7x
topology: tpu7x:2x2x1
jax: 0.10.0
libtpu: 0.0.40
codegen_flags: <defaults>
</compile_context>

<pallas_src>
import functools

import jax
import jax.numpy as jnp
from jax.experimental import pallas as pl
from jax.experimental.pallas import tpu as pltpu

INPUT_SIZE = 784
HIDDEN_SIZE = 500
NUM_CLASSES = 10

H_PAD = 512           # hidden padded to a multiple of 128 (full MXU tiles)
C_PAD = 128           # lane-dense output width
MAX_BATCH_TILE = 1024  # amortizes per-grid-step overhead; ~9 MB VMEM at f32 x
TILE_ALIGN = 16        # sublane alignment (covers bf16 packing of the output)


def _round_up(n, m):
    return (n + m - 1) // m * m


def _choose_batch_tile(B):
    """Pick (tile, n_tiles): big tiles, >=2 tiles for megacore, low pad waste."""
    if B <= TILE_ALIGN:
        n_tiles = 1
    else:
        # >=2 tiles so dimension_semantics=("parallel",) can use both TCs on
        # v7x; more tiles only when a single tile would exceed MAX_BATCH_TILE.
        n_tiles = max(2, -(-B // MAX_BATCH_TILE))
    tb = _round_up(-(-B // n_tiles), TILE_ALIGN)
    n_tiles = -(-B // tb)          # rounding tb up may reduce the tile count
    return tb, n_tiles


def mlp_kernel(x_ref, w1_ref, b1_ref, w2_ref, b2_ref, out_ref):
    # Cast x f32 -> bf16 in-kernel (VPU work hidden under the MXU/DMA).
    x_bf = x_ref[...].astype(jnp.bfloat16)
    # fc1: (TB, 784)bf16 @ (784, 512)bf16 -> f32 accumulate on the MXU
    h = jnp.dot(x_bf, w1_ref[...], preferred_element_type=jnp.float32)
    h = jnp.maximum(h + b1_ref[...], 0.0)                      # bias + ReLU (f32)
    # fc2: (TB, 512)bf16 @ (512, 128)bf16 -> f32 accumulate
    out = jnp.dot(h.astype(jnp.bfloat16), w2_ref[...],
                  preferred_element_type=jnp.float32)
    # bf16 store halves the output writeback; wrapper upcasts.
    out_ref[...] = (out + b2_ref[...]).astype(jnp.bfloat16)


def prepare_params(w1_t, b1, w2_t, b2):
    """One-time weight prep (call ONCE, outside the forward/attack loop).

    w1_t: (784, 500) f32 (pre-transposed nn.Linear weight, i.e. (in, out))
    b1:   (1, 500)   f32
    w2_t: (500, 10)  f32
    b2:   (1, 10)    f32
    Returns padded / bf16-cast params for the kernel.
    """
    w1_p = jnp.pad(w1_t, ((0, 0), (0, H_PAD - HIDDEN_SIZE))).astype(jnp.bfloat16)
    b1_p = jnp.pad(b1, ((0, 0), (0, H_PAD - HIDDEN_SIZE)))              # f32
    w2_p = jnp.pad(w2_t, ((0, H_PAD - HIDDEN_SIZE),
                          (0, C_PAD - NUM_CLASSES))).astype(jnp.bfloat16)
    b2_p = jnp.pad(b2, ((0, 0), (0, C_PAD - NUM_CLASSES)))              # f32
    return w1_p, b1_p, w2_p, b2_p


def neural_net_forward(x, prepared_params):
    """Forward pass. x: (B, 784) f32. Returns (B, 10) f32 logits."""
    w1_p, b1_p, w2_p, b2_p = prepared_params
    B = x.shape[0]

    tb, n_tiles = _choose_batch_tile(B)
    Bp = tb * n_tiles
    if Bp != B:
        x = jnp.pad(x, ((0, Bp - B), (0, 0)))

    flops = 2 * Bp * (INPUT_SIZE * H_PAD + H_PAD * C_PAD)
    bytes_accessed = (Bp * INPUT_SIZE * 4            # x (f32 in)
                      + INPUT_SIZE * H_PAD * 2       # w1 (bf16)
                      + H_PAD * 4                    # b1 (f32)
                      + H_PAD * C_PAD * 2            # w2 (bf16)
                      + C_PAD * 4                    # b2 (f32)
                      + Bp * C_PAD * 2)              # out (bf16)

    out = pl.pallas_call(
        mlp_kernel,
        out_shape=jax.ShapeDtypeStruct((Bp, C_PAD), jnp.bfloat16),
        grid_spec=pl.GridSpec(
            grid=(n_tiles,),
            in_specs=[
                # x: one batch tile per grid step (f32, cast in-kernel)
                pl.BlockSpec((tb, INPUT_SIZE), lambda i: (i, 0)),
                # weights / biases: constant block index -> stay VMEM-resident
                pl.BlockSpec((INPUT_SIZE, H_PAD), lambda i: (0, 0)),
                pl.BlockSpec((1, H_PAD), lambda i: (0, 0)),
                pl.BlockSpec((H_PAD, C_PAD), lambda i: (0, 0)),
                pl.BlockSpec((1, C_PAD), lambda i: (0, 0)),
            ],
            out_specs=pl.BlockSpec((tb, C_PAD), lambda i: (i, 0)),
        ),
        compiler_params=pltpu.CompilerParams(
            # Batch tiles are independent -> shard across TCs on v7x megacore.
            dimension_semantics=("parallel",),
        ),
        cost_estimate=pl.CostEstimate(flops=flops, transcendentals=0,
                                      bytes_accessed=bytes_accessed),
    )(x, w1_p, b1_p, w2_p, b2_p)

    return out[:B, :NUM_CLASSES].astype(jnp.float32)


def init_params(key):
    """Deterministic init mimicking PyTorch nn.Linear default (uniform +/- 1/sqrt(fan_in))."""
    k1, k2, k3, k4 = jax.random.split(key, 4)
    bound1 = 1.0 / (INPUT_SIZE ** 0.5)
    bound2 = 1.0 / (HIDDEN_SIZE ** 0.5)
    # PyTorch stores weight as (out, in); we keep the transposed (in, out) form.
    w1_t = jax.random.uniform(k1, (INPUT_SIZE, HIDDEN_SIZE), jnp.float32,
                              minval=-bound1, maxval=bound1)
    b1 = jax.random.uniform(k2, (1, HIDDEN_SIZE), jnp.float32,
                            minval=-bound1, maxval=bound1)
    w2_t = jax.random.uniform(k3, (HIDDEN_SIZE, NUM_CLASSES), jnp.float32,
                              minval=-bound2, maxval=bound2)
    b2 = jax.random.uniform(k4, (1, NUM_CLASSES), jnp.float32,
                            minval=-bound2, maxval=bound2)
    return w1_t, b1, w2_t, b2


def _reference(x, w1_t, b1, w2_t, b2):
    # Same bf16-quantized operand path as the kernel (bf16 matmul operands,
    # f32 accumulation, bf16 output store), math otherwise in f32.
    xb = x.astype(jnp.bfloat16).astype(jnp.float32)
    w1b = w1_t.astype(jnp.bfloat16).astype(jnp.float32)
    w2b = w2_t.astype(jnp.bfloat16).astype(jnp.float32)
    h = jnp.maximum(xb @ w1b + b1, 0.0)
    out = h.astype(jnp.bfloat16).astype(jnp.float32) @ w2b + b2
    return out.astype(jnp.bfloat16).astype(jnp.float32)


if __name__ == "__main__":
    key = jax.random.PRNGKey(0)
    kx, kp, kx2 = jax.random.split(key, 3)

    w1_t, b1, w2_t, b2 = init_params(kp)
    params = prepare_params(w1_t, b1, w2_t, b2)   # one-time prep (hoisted)

    # Small batch (single grid step, batch padded up to the sublane tile).
    batch = 8
    x = jax.random.normal(kx, (batch, INPUT_SIZE), jnp.float32)
    out = jax.block_until_ready(neural_net_forward(x, params))
    ref = _reference(x, w1_t, b1, w2_t, b2)
    assert out.shape == (batch, NUM_CLASSES)
    assert jnp.allclose(out, ref, atol=3e-2, rtol=3e-2)

    # Larger odd batch: exercises the multi-tile (megacore) grid + adaptive
    # tiling path (B=300 -> tb=160, 2 tiles, Bp=320).
    batch2 = 300
    x2 = jax.random.normal(kx2, (batch2, INPUT_SIZE), jnp.float32)
    out2 = jax.block_until_ready(neural_net_forward(x2, params))
    ref2 = _reference(x2, w1_t, b1, w2_t, b2)
    assert out2.shape == (batch2, NUM_CLASSES)
    assert jnp.allclose(out2, ref2, atol=3e-2, rtol=3e-2)

    print("KERNEL_OK")
</pallas_src>

<mosaic_0001>
module attributes {stable_mosaic.version = 11 : i64} {
  func.func @mlp_kernel(%arg0: i32, %arg1: memref<16x784xf32, #tpu.memory_space<vmem>>, %arg2: memref<784x512xbf16, #tpu.memory_space<vmem>>, %arg3: memref<1x512xf32, #tpu.memory_space<vmem>>, %arg4: memref<512x128xbf16, #tpu.memory_space<vmem>>, %arg5: memref<1x128xf32, #tpu.memory_space<vmem>>, %arg6: memref<16x128xbf16, #tpu.memory_space<vmem>>) attributes {dimension_semantics = [#tpu.dimension_semantics<parallel>], iteration_bounds = array<i64: 1>, scalar_prefetch = 0 : i64, scratch_operands = 0 : i64, tpu.core_type = #tpu.core_type<tc>, window_params = [{transform_indices = @transform_0, window_bounds = array<i64: 16, 784>}, {pipeline_mode = #tpu.pipeline_mode<synchronous>, transform_indices = @transform_1, window_bounds = array<i64: 784, 512>}, {pipeline_mode = #tpu.pipeline_mode<synchronous>, transform_indices = @transform_2, window_bounds = array<i64: 1, 512>}, {pipeline_mode = #tpu.pipeline_mode<synchronous>, transform_indices = @transform_3, window_bounds = array<i64: 512, 128>}, {pipeline_mode = #tpu.pipeline_mode<synchronous>, transform_indices = @transform_4, window_bounds = array<i64: 1, 128>}, {transform_indices = @transform_5, window_bounds = array<i64: 16, 128>}]} {
    %c0 = arith.constant 0 : index
    %c0_0 = arith.constant 0 : index
    %0 = vector.load %arg1[%c0, %c0_0] : memref<16x784xf32, #tpu.memory_space<vmem>>, vector<16x784xf32>
    %1 = arith.truncf %0 : vector<16x784xf32> to vector<16x784xbf16>
    %c0_1 = arith.constant 0 : index
    %c0_2 = arith.constant 0 : index
    %2 = vector.load %arg2[%c0_1, %c0_2] : memref<784x512xbf16, #tpu.memory_space<vmem>>, vector<784x512xbf16>
    %cst = arith.constant dense<0.000000e+00> : vector<16x512xf32>
    %3 = tpu.matmul %1, %2, %cst {dimension_numbers = #tpu.dot_dimension_numbers<[1], [0], [0], [1], [0, 0, 1, 1], [], []>} : vector<16x784xbf16>, vector<784x512xbf16>, vector<16x512xf32> -> vector<16x512xf32>
    %c0_3 = arith.constant 0 : index
    %c0_4 = arith.constant 0 : index
    %4 = vector.load %arg3[%c0_3, %c0_4] : memref<1x512xf32, #tpu.memory_space<vmem>>, vector<1x512xf32>
    %5 = vector.broadcast %4 : vector<1x512xf32> to vector<16x512xf32>
    %6 = arith.addf %3, %5 : vector<16x512xf32>
    %cst_5 = arith.constant 0.000000e+00 : f32
    %7 = vector.broadcast %cst_5 : f32 to vector<16x512xf32>
    %8 = arith.maximumf %6, %7 : vector<16x512xf32>
    %9 = arith.truncf %8 : vector<16x512xf32> to vector<16x512xbf16>
    %c0_6 = arith.constant 0 : index
    %c0_7 = arith.constant 0 : index
    %10 = vector.load %arg4[%c0_6, %c0_7] : memref<512x128xbf16, #tpu.memory_space<vmem>>, vector<512x128xbf16>
    %cst_8 = arith.constant dense<0.000000e+00> : vector<16x128xf32>
    %11 = tpu.matmul %9, %10, %cst_8 {dimension_numbers = #tpu.dot_dimension_numbers<[1], [0], [0], [1], [0, 0, 1, 1], [], []>} : vector<16x512xbf16>, vector<512x128xbf16>, vector<16x128xf32> -> vector<16x128xf32>
    %c0_9 = arith.constant 0 : index
    %c0_10 = arith.constant 0 : index
    %12 = vector.load %arg5[%c0_9, %c0_10] : memref<1x128xf32, #tpu.memory_space<vmem>>, vector<1x128xf32>
    %13 = vector.broadcast %12 : vector<1x128xf32> to vector<16x128xf32>
    %14 = arith.addf %11, %13 : vector<16x128xf32>
    %15 = arith.truncf %14 : vector<16x128xf32> to vector<16x128xbf16>
    %c0_11 = arith.constant 0 : index
    %c0_12 = arith.constant 0 : index
    %16 = vector.load %arg6[%c0_11, %c0_12] : memref<16x128xbf16, #tpu.memory_space<vmem>>, vector<16x128xbf16>
    tpu.vector_store %arg6[%c0_11, %c0_12], %15 {strides = array<i32>} : memref<16x128xbf16, #tpu.memory_space<vmem>>, vector<16x128xbf16>,
    return
  }
  func.func @transform_0(%arg0: i32) -> (i32, i32) {
    %c0_i32 = arith.constant 0 : i32
    %c0_i32_0 = arith.constant 0 : i32
    return %arg0, %c0_i32 : i32, i32
  }
  func.func @transform_1(%arg0: i32) -> (i32, i32) {
    %c0_i32 = arith.constant 0 : i32
    %c0_i32_0 = arith.constant 0 : i32
    %c0_i32_1 = arith.constant 0 : i32
    return %c0_i32, %c0_i32_0 : i32, i32
  }
  func.func @transform_2(%arg0: i32) -> (i32, i32) {
    %c0_i32 = arith.constant 0 : i32
    %c0_i32_0 = arith.constant 0 : i32
    %c0_i32_1 = arith.constant 0 : i32
    return %c0_i32, %c0_i32_0 : i32, i32
  }
  func.func @transform_3(%arg0: i32) -> (i32, i32) {
    %c0_i32 = arith.constant 0 : i32
    %c0_i32_0 = arith.constant 0 : i32
    %c0_i32_1 = arith.constant 0 : i32
    return %c0_i32, %c0_i32_0 : i32, i32
  }
  func.func @transform_4(%arg0: i32) -> (i32, i32) {
    %c0_i32 = arith.constant 0 : i32
    %c0_i32_0 = arith.constant 0 : i32
    %c0_i32_1 = arith.constant 0 : i32
    return %c0_i32, %c0_i32_0 : i32, i32
  }
  func.func @transform_5(%arg0: i32) -> (i32, i32) {
    %c0_i32 = arith.constant 0 : i32
    %c0_i32_0 = arith.constant 0 : i32
    return %arg0, %c0_i32 : i32, i32
  }
}

</mosaic_0001>

<bundles_post_ra>
// kernel: tpu_custom_call.1
= control target key start
LH: loop header
LB: loop body
LE: loop exit
PB: predicated region body
PF: predicated region fallthrough
CT: control target
= control target key end

     0   :  { %10 = vsyncpa [#allocation3], 0  ;;  %s2863_s0 = inlined_call_operand.hbm [shape: f32[16,784], index: 0, kind: input, shape index: {}]   ;;  %s2864_s1 = inlined_call_operand.hbm [shape: bf16[784,512], index: 1, kind: input, shape index: {}]   ;;  %s2865_s2 = inlined_call_operand.vmem [shape: f32[1,512], index: 2, kind: input, shape index: {}]   ;;  %s2866_s3 = inlined_call_operand.hbm [shape: bf16[512,128], index: 3, kind: input, shape index: {}]   ;;  %s2867_s4 = inlined_call_operand.vmem [shape: f32[1,128], index: 4, kind: input, shape index: {}]   ;;  %s2868_s5 = inlined_call_operand.hbm [shape: bf16[16,128], index: 5, kind: output, shape index: {}]  }
   0x1   :  { %11 = vsyncpa [#allocation6], 0 }
   0x2   :  { %12 = vsyncpa [#allocation4], 0  ;;  %s2762_s18 = smov [#allocation5]   ;;  %s2668_s22 = scalar_lea.hbm %s2864_s1, 25088 }
   0x3   :  { %s30_s19 = sshll.u32 %s2762_s18, 4  ;;  %p2669_p0 = scmp.ne.s32.totalorder %s2864_s1, %s2668_s22  ;;  %s31_s19 = int_to_ptr.vmem [resolvable:$true] %s30_s19 }
   0x4   :  { %p2672_p1 = scmp.lt.u32.totalorder %s2668_s22, %s2864_s1 }
   0x6   :  { %p2674_p2 = pnand %p2672_p1, %p2669_p0 }
   0x8   :  { %2677 = shalt.err (!%p2674_p2)
}
   0x9   :  { %s2678_s27 = scalar_lea.vmem %s31_s19, 25088  ;;  %p2683_p4 = scmp.lt.s32.totalorder %s31_s19, %s31_s19 }
   0xa   :  { %p2679_p3 = scmp.ne.s32.totalorder %s31_s19, %s2678_s27  ;;  %p2684_p5 = scmp.lt.s32.totalorder %s2678_s27, %s2678_s27 }
   0xc   :  { %p2685_p6 = por %p2684_p5, %p2683_p4 }
   0xe   :  { %p2686_p7 = pnand %p2685_p6, %p2679_p3 }
  0x10   :  { %2689 = shalt.err (!%p2686_p7)
}
  0x11   :  { %s2763_s28 = smov 256   ;;  %s2764_s29 = smov 16  }
  0x12   :  { %36 = dma.hbm_to_vmem [thread:$0]  %s2864_s1, 25088, %s31_s19, [#allocation6], %s2763_s28, %s2763_s28, %s2764_s29  }
  0x13   :  { %s2765_s7 = smov [#allocation2]   ;;  %s2690_s11 = scalar_lea.hbm %s2863_s0, 1792 }
  0x14   :  { %s18_s8 = sshll.u32 %s2765_s7, 4  ;;  %p2691_p8 = scmp.ne.s32.totalorder %s2863_s0, %s2690_s11  ;;  %s19_s8 = int_to_ptr.vmem [resolvable:$true] %s18_s8 }
  0x15   :  { %p2694_p9 = scmp.lt.u32.totalorder %s2690_s11, %s2863_s0 }
  0x17   :  { %p2696_p10 = pnand %p2694_p9, %p2691_p8 }
  0x19   :  { %2699 = shalt.err (!%p2696_p10)
}
  0x1a   :  { %s2700_s16 = scalar_lea.vmem %s19_s8, 1792  ;;  %p2705_p12 = scmp.lt.s32.totalorder %s19_s8, %s19_s8 }
  0x1b   :  { %p2701_p11 = scmp.ne.s32.totalorder %s19_s8, %s2700_s16  ;;  %p2706_p13 = scmp.lt.s32.totalorder %s2700_s16, %s2700_s16 }
  0x1d   :  { %p2707_p0 = por %p2706_p13, %p2705_p12 }
  0x1f   :  { %p2708_p1 = pnand %p2707_p0, %p2701_p11 }
  0x21   :  { %2711 = shalt.err (!%p2708_p1)
}
  0x22   :  { %s2766_s1 = smov 896   ;;  %s2767_s17 = smov 56  }
  0x23   :  { %24 = dma.hbm_to_vmem [thread:$0]  %s2863_s0, 1792, %s19_s8, [#allocation3], %s2766_s1, %s2766_s1, %s2767_s17  }
  0x24   :  { %s2768_s20 = smov [#allocation7]   ;;  %s2712_s24 = scalar_lea.hbm %s2866_s3, 4096 }
  0x25   :  { %s44_s21 = sshll.u32 %s2768_s20, 4  ;;  %p2713_p2 = scmp.ne.s32.totalorder %s2866_s3, %s2712_s24  ;;  %s45_s21 = int_to_ptr.vmem [resolvable:$true] %s44_s21 }
  0x26   :  { %p2716_p3 = scmp.lt.u32.totalorder %s2712_s24, %s2866_s3 }
  0x28   :  { %p2718_p4 = pnand %p2716_p3, %p2713_p2 }
  0x2a   :  { %2721 = shalt.err (!%p2718_p4)
}
  0x2b   :  { %s2722_s29 = scalar_lea.vmem %s45_s21, 4096  ;;  %p2727_p6 = scmp.lt.s32.totalorder %s45_s21, %s45_s21 }
  0x2c   :  { %p2723_p5 = scmp.ne.s32.totalorder %s45_s21, %s2722_s29  ;;  %p2728_p7 = scmp.lt.s32.totalorder %s2722_s29, %s2722_s29 }
  0x2e   :  { %p2729_p8 = por %p2728_p7, %p2727_p6 }
  0x30   :  { %p2730_p9 = pnand %p2729_p8, %p2723_p5 }
  0x32   :  { %2733 = shalt.err (!%p2730_p9)
}
  0x33   :  { %s2769_s0 = smov 64   ;;  %s2770_s30 = smov 4  }
  0x34   :  { %50 = dma.hbm_to_vmem [thread:$0]  %s2866_s3, 4096, %s45_s21, [#allocation6], %s2769_s0, %s2769_s0, %s2770_s30  }
  0x35   :  { %2756 = dma.done.wait [#allocation3], 1792  }
  0x36   :  { %2757 = vsyncadd [#allocation3], 4294965504 }
  0x37   :  { %2758 = dma.done.wait [#allocation6], 29184  }
  0x38   :  { %2759 = vsyncadd [#allocation6], 4294938112  ;;  %v2342_v0 = vld [vmem:[#allocation5 + $0x4] ss:$16 sps:$4 sm:$0xff]   ;;  %v2344_v1 = vld [vmem:[#allocation5 + $0xc] ss:$16 sps:$4 sm:$0xff]  }
  0x39   :  { %1286 = vmatprep.subr.bf16.mxu0 %v2342_v0  ;;  %v2346_v2 = vld [vmem:[#allocation5] ss:$16 sps:$4 sm:$0xff]   ;;  %v2347_v3 = vld [vmem:[#allocation5 + $0x8] ss:$16 sps:$4 sm:$0xff]   ;;  %1458 = vmatprep.subr.bf16.mxu1 %v2344_v1  ;;  %v2348_v4 = vld [vmem:[#allocation5 + $0x24] ss:$16 sps:$4 sm:$0xff]  }
  0x3a   :  { %1287 = vmatpush1.bf16.msra.mxu0 %v2346_v2  ;;  %1459 = vmatpush1.bf16.msra.mxu1 %v2347_v3  ;;  %v2350_v5 = vld [vmem:[#allocation5 + $0x2c] ss:$16 sps:$4 sm:$0xff]   ;;  %v2352_v6 = vld [vmem:[#allocation5 + $0x20] ss:$16 sps:$4 sm:$0xff]   ;;  %v2353_v7 = vld [vmem:[#allocation5 + $0x28] ss:$16 sps:$4 sm:$0xff]  }
  0x3b   :  { %1288 = vmatprep.subr.bf16.mxu0 %v2348_v4  ;;  %1460 = vmatprep.subr.bf16.mxu1 %v2350_v5  ;;  %v2354_v8 = vld [vmem:[#allocation5 + $0x44] ss:$16 sps:$4 sm:$0xff]   ;;  %v2356_v9 = vld [vmem:[#allocation5 + $0x4c] ss:$16 sps:$4 sm:$0xff]   ;;  %v2358_v10 = vld [vmem:[#allocation5 + $0x40] ss:$16 sps:$4 sm:$0xff]  }
  0x3c   :  { %v2359_v11 = vld [vmem:[#allocation5 + $0x48] ss:$16 sps:$4 sm:$0xff]   ;;  %v2360_v12 = vld [vmem:[#allocation5 + $0x64] ss:$16 sps:$4 sm:$0xff]   ;;  %v2362_v13 = vld [vmem:[#allocation5 + $0x6c] ss:$16 sps:$4 sm:$0xff]  }
  0x3d   :  { %v2364_v14 = vld [vmem:[#allocation5 + $0x60] ss:$16 sps:$4 sm:$0xff]   ;;  %v2365_v15 = vld [vmem:[#allocation5 + $0x68] ss:$16 sps:$4 sm:$0xff]   ;;  %v2366_v16 = vld [vmem:[#allocation5 + $0x84] ss:$16 sps:$4 sm:$0xff]  }
  0x3e   :  { %1289 = vmatpush1.bf16.msra.mxu0 %v2352_v6  ;;  %1461 = vmatpush1.bf16.msra.mxu1 %v2353_v7  ;;  %v2368_v17 = vld [vmem:[#allocation5 + $0x8c] ss:$16 sps:$4 sm:$0xff]   ;;  %v2370_v18 = vld [vmem:[#allocation5 + $0x80] ss:$16 sps:$4 sm:$0xff]   ;;  %v2371_v19 = vld [vmem:[#allocation5 + $0x88] ss:$16 sps:$4 sm:$0xff]  }
  0x3f   :  { %1290 = vmatprep.subr.bf16.mxu0 %v2354_v8  ;;  %1462 = vmatprep.subr.bf16.mxu1 %v2356_v9  ;;  %v2372_v20 = vld [vmem:[#allocation5 + $0xa4] ss:$16 sps:$4 sm:$0xff]   ;;  %v2374_v21 = vld [vmem:[#allocation5 + $0xac] ss:$16 sps:$4 sm:$0xff]   ;;  %v2376_v22 = vld [vmem:[#allocation5 + $0xa0] ss:$16 sps:$4 sm:$0xff]  }
  0x40   :  { %v2377_v23 = vld [vmem:[#allocation5 + $0xa8] ss:$16 sps:$4 sm:$0xff]   ;;  %v2378_v24 = vld [vmem:[#allocation5 + $0xc4] ss:$16 sps:$4 sm:$0xff]   ;;  %v2380_v25 = vld [vmem:[#allocation5 + $0xcc] ss:$16 sps:$4 sm:$0xff]  }
  0x41   :  { %v2382_v26 = vld [vmem:[#allocation5 + $0xc0] ss:$16 sps:$4 sm:$0xff]   ;;  %v2383_v27 = vld [vmem:[#allocation5 + $0xc8] ss:$16 sps:$4 sm:$0xff]   ;;  %v2384_v28 = vld [vmem:[#allocation5 + $0xe4] ss:$16 sps:$4 sm:$0xff]  }
  0x42   :  { %1291 = vmatpush1.bf16.msra.mxu0 %v2358_v10  ;;  %1463 = vmatpush1.bf16.msra.mxu1 %v2359_v11  ;;  %v2386_v29 = vld [vmem:[#allocation5 + $0xec] ss:$16 sps:$4 sm:$0xff]   ;;  %v2388_v30 = vld [vmem:[#allocation5 + $0xe0] ss:$16 sps:$4 sm:$0xff]   ;;  %v2389_v31 = vld [vmem:[#allocation5 + $0xe8] ss:$16 sps:$4 sm:$0xff]  }
  0x43   :  { %1292 = vmatprep.subr.bf16.mxu0 %v2360_v12  ;;  %1464 = vmatprep.subr.bf16.mxu1 %v2362_v13  ;;  %v2390_v32 = vld [vmem:[#allocation5 + $0x104] ss:$16 sps:$4 sm:$0xff]   ;;  %v2392_v33 = vld [vmem:[#allocation5 + $0x10c] ss:$16 sps:$4 sm:$0xff]   ;;  %v2394_v34 = vld [vmem:[#allocation5 + $0x100] ss:$16 sps:$4 sm:$0xff]  }
  0x44   :  { %v2395_v35 = vld [vmem:[#allocation5 + $0x108] ss:$16 sps:$4 sm:$0xff]   ;;  %v2396_v36 = vld [vmem:[#allocation5 + $0x124] ss:$16 sps:$4 sm:$0xff]   ;;  %v2398_v37 = vld [vmem:[#allocation5 + $0x12c] ss:$16 sps:$4 sm:$0xff]  }
  0x45   :  { %v2400_v38 = vld [vmem:[#allocation5 + $0x120] ss:$16 sps:$4 sm:$0xff]   ;;  %v2401_v39 = vld [vmem:[#allocation5 + $0x128] ss:$16 sps:$4 sm:$0xff]   ;;  %v2402_v40 = vld [vmem:[#allocation5 + $0x144] ss:$16 sps:$4 sm:$0xff]  }
  0x46   :  { %1293 = vmatpush1.bf16.msra.mxu0 %v2364_v14  ;;  %1465 = vmatpush1.bf16.msra.mxu1 %v2365_v15  ;;  %v2404_v41 = vld [vmem:[#allocation5 + $0x14c] ss:$16 sps:$4 sm:$0xff]   ;;  %v2406_v42 = vld [vmem:[#allocation5 + $0x140] ss:$16 sps:$4 sm:$0xff]   ;;  %v2407_v43 = vld [vmem:[#allocation5 + $0x148] ss:$16 sps:$4 sm:$0xff]  }
  0x47   :  { %1294 = vmatprep.subr.bf16.mxu0 %v2366_v16  ;;  %1466 = vmatprep.subr.bf16.mxu1 %v2368_v17  ;;  %v2408_v44 = vld [vmem:[#allocation5 + $0x164] ss:$16 sps:$4 sm:$0xff]   ;;  %v2410_v45 = vld [vmem:[#allocation5 + $0x16c] ss:$16 sps:$4 sm:$0xff]   ;;  %v2412_v48 = vld [vmem:[#allocation5 + $0x160] ss:$16 sps:$4 sm:$0xff]  }
  0x48   :  { %v64_v46 = vld [vmem:[#allocation2 + $0x8] sm:$0xff]  ;;  %v71_v47 = vld [vmem:[#allocation2 + $0x40] sm:$0xff]  ;;  %v70_v5 = vld [vmem:[#allocation2 + $0x38] sm:$0xff]  ;;  %vm1282_vm0 = vcmask 130048   ;;  %s2772_s10 = smov [#allocation8]  }
  0x49   :  { %v2413_v49 = vld [vmem:[#allocation5 + $0x168] ss:$16 sps:$4 sm:$0xff]   ;;  %v78_v50 = vpack.c.bf16 %v71_v47, %v64_v46  ;;  %v2414_v51 = vld [vmem:[#allocation5 + $0x184] ss:$16 sps:$4 sm:$0xff]   ;;  %v2416_v52 = vld [vmem:[#allocation5 + $0x18c] ss:$16 sps:$4 sm:$0xff]  }
  0x4a   :  { %1295 = vmatpush1.bf16.msra.mxu0 %v2370_v18  ;;  %1467 = vmatpush1.bf16.msra.mxu1 %v2371_v19  ;;  %v2418_v53 = vld [vmem:[#allocation5 + $0x180] ss:$16 sps:$4 sm:$0xff]   ;;  %v2419_v54 = vld [vmem:[#allocation5 + $0x188] ss:$16 sps:$4 sm:$0xff]   ;;  %v2420_v55 = vld [vmem:[#allocation5 + $0x1a4] ss:$16 sps:$4 sm:$0xff]  }
  0x4b   :  { %1296 = vmatprep.subr.bf16.mxu0 %v2372_v20  ;;  %1468 = vmatprep.subr.bf16.mxu1 %v2374_v21  ;;  %v2422_v56 = vld [vmem:[#allocation5 + $0x1ac] ss:$16 sps:$4 sm:$0xff]   ;;  %v2424_v57 = vld [vmem:[#allocation5 + $0x1a0] ss:$16 sps:$4 sm:$0xff]   ;;  %v2425_v58 = vld [vmem:[#allocation5 + $0x1a8] ss:$16 sps:$4 sm:$0xff]  }
  0x4c   :  { %1318 = vmatprep.mubr.bf16.mxu0 %v78_v50  ;;  %1490 = vmatprep.mubr.bf16.mxu1 %v78_v50  ;;  %v2426_v59 = vld [vmem:[#allocation5 + $0x1c4] ss:$16 sps:$4 sm:$0xff]   ;;  %v2428_v60 = vld [vmem:[#allocation5 + $0x1cc] ss:$16 sps:$4 sm:$0xff]   ;;  %v2430_v61 = vld [vmem:[#allocation5 + $0x1c0] ss:$16 sps:$4 sm:$0xff]  }
  0x4d   :  { %v2431_v62 = vld [vmem:[#allocation5 + $0x1c8] ss:$16 sps:$4 sm:$0xff]   ;;  %v2432_v63 = vld [vmem:[#allocation5 + $0x1e4] ss:$16 sps:$4 sm:$0xff]   ;;  %v2434_v0 = vld [vmem:[#allocation5 + $0x1ec] ss:$16 sps:$4 sm:$0xff]  }
  0x4e   :  { %1297 = vmatpush1.bf16.msra.mxu0 %v2376_v22  ;;  %1469 = vmatpush1.bf16.msra.mxu1 %v2377_v23  ;;  %v2436_v1 = vld [vmem:[#allocation5 + $0x1e0] ss:$16 sps:$4 sm:$0xff]   ;;  %v2437_v2 = vld [vmem:[#allocation5 + $0x1e8] ss:$16 sps:$4 sm:$0xff]   ;;  %v2440_v3 = vld [vmem:[#allocation5 + $0x204] ss:$16 sps:$4 sm:$0xff]  }
  0x4f   :  { %1298 = vmatprep.subr.bf16.mxu0 %v2378_v24  ;;  %1470 = vmatprep.subr.bf16.mxu1 %v2380_v25  ;;  %v63_v4 = vld [vmem:[#allocation2] sm:$0xff]  ;;  %v2443_v6 = vld [vmem:[#allocation5 + $0x20c] ss:$16 sps:$4 sm:$0xff]   ;;  %v2441_v8 = vld [vmem:[#allocation5 + $0x208] ss:$16 sps:$4 sm:$0xff]   ;;  %s2002_s11 = sshll.u32 %s2772_s10, 4  ;;  %s2003_s11 = int_to_ptr.vmem [resolvable:$true] %s2002_s11 }
  0x50   :  { %v2438_v7 = vld [vmem:[#allocation5 + $0x200] ss:$16 sps:$4 sm:$0xff]   ;;  %v77_v9 = vpack.c.bf16 %v70_v5, %v63_v4  ;;  %v2446_v10 = vld [vmem:[#allocation5 + $0x224] ss:$16 sps:$4 sm:$0xff]   ;;  %v2449_v11 = vld [vmem:[#allocation5 + $0x22c] ss:$16 sps:$4 sm:$0xff]   ;;  %p2739_p11 = scmp.lt.s32.totalorder %s2003_s11, %s2003_s11 }
  0x51   :  { %v2444_v12 = vld [vmem:[#allocation5 + $0x220] ss:$16 sps:$4 sm:$0xff]   ;;  %v2447_v13 = vld [vmem:[#allocation5 + $0x228] ss:$16 sps:$4 sm:$0xff]   ;;  %v2452_v14 = vld [vmem:[#allocation5 + $0x244] ss:$16 sps:$4 sm:$0xff]  }
  0x52   :  { %1299 = vmatpush1.bf16.msra.mxu0 %v2382_v26  ;;  %1471 = vmatpush1.bf16.msra.mxu1 %v2383_v27  ;;  %v2455_v15 = vld [vmem:[#allocation5 + $0x24c] ss:$16 sps:$4 sm:$0xff]   ;;  %v2450_v16 = vld [vmem:[#allocation5 + $0x240] ss:$16 sps:$4 sm:$0xff]   ;;  %v2453_v17 = vld [vmem:[#allocation5 + $0x248] ss:$16 sps:$4 sm:$0xff]  }
  0x53   :  { %1300 = vmatprep.subr.bf16.mxu0 %v2384_v28  ;;  %1472 = vmatprep.subr.bf16.mxu1 %v2386_v29  ;;  %v2458_v18 = vld [vmem:[#allocation5 + $0x264] ss:$16 sps:$4 sm:$0xff]   ;;  %v2461_v19 = vld [vmem:[#allocation5 + $0x26c] ss:$16 sps:$4 sm:$0xff]   ;;  %v2456_v20 = vld [vmem:[#allocation5 + $0x260] ss:$16 sps:$4 sm:$0xff]  }
  0x54   :  { %v2459_v21 = vld [vmem:[#allocation5 + $0x268] ss:$16 sps:$4 sm:$0xff]   ;;  %v2464_v22 = vld [vmem:[#allocation5 + $0x284] ss:$16 sps:$4 sm:$0xff]   ;;  %v2467_v23 = vld [vmem:[#allocation5 + $0x28c] ss:$16 sps:$4 sm:$0xff]  }
  0x55   :  { %v2462_v24 = vld [vmem:[#allocation5 + $0x280] ss:$16 sps:$4 sm:$0xff]   ;;  %v2465_v25 = vld [vmem:[#allocation5 + $0x288] ss:$16 sps:$4 sm:$0xff]   ;;  %v2470_v26 = vld [vmem:[#allocation5 + $0x2a4] ss:$16 sps:$4 sm:$0xff]  }
  0x56   :  { %1301 = vmatpush1.bf16.msra.mxu0 %v2388_v30  ;;  %1473 = vmatpush1.bf16.msra.mxu1 %v2389_v31  ;;  %v2473_v27 = vld [vmem:[#allocation5 + $0x2ac] ss:$16 sps:$4 sm:$0xff]   ;;  %v2468_v28 = vld [vmem:[#allocation5 + $0x2a0] ss:$16 sps:$4 sm:$0xff]   ;;  %v2471_v29 = vld [vmem:[#allocation5 + $0x2a8] ss:$16 sps:$4 sm:$0xff]  }
  0x57   :  { %1302 = vmatprep.subr.bf16.mxu0 %v2390_v32  ;;  %1474 = vmatprep.subr.bf16.mxu1 %v2392_v33  ;;  %v2476_v30 = vld [vmem:[#allocation5 + $0x2c4] ss:$16 sps:$4 sm:$0xff]   ;;  %v2479_v31 = vld [vmem:[#allocation5 + $0x2cc] ss:$16 sps:$4 sm:$0xff]   ;;  %v2492_v47 = vld [vmem:[#allocation5 + $0x320] ss:$16 sps:$4 sm:$0xff]  }
  0x58   :  { %v66_v32 = vld [vmem:[#allocation2 + $0x18] sm:$0xff]  ;;  %v73_v33 = vld [vmem:[#allocation2 + $0x50] sm:$0xff] }
  0x59   :  { %v2497_v46 = vld [vmem:[#allocation5 + $0x32c] ss:$16 sps:$4 sm:$0xff]   ;;  %v2525_v4 = vld [vmem:[#allocation5 + $0x3c8] ss:$16 sps:$4 sm:$0xff]   ;;  %v2530_v5 = vld [vmem:[#allocation5 + $0x3e4] ss:$16 sps:$4 sm:$0xff]  }
  0x5a   :  { %1303 = vmatpush1.bf16.msra.mxu0 %v2394_v34  ;;  %1475 = vmatpush1.bf16.msra.mxu1 %v2395_v35  ;;  %v2474_v34 = vld [vmem:[#allocation5 + $0x2c0] ss:$16 sps:$4 sm:$0xff]   ;;  %v2477_v35 = vld [vmem:[#allocation5 + $0x2c8] ss:$16 sps:$4 sm:$0xff]   ;;  %v2503_v50 = vld [vmem:[#allocation5 + $0x34c] ss:$16 sps:$4 sm:$0xff]  }
  0x5b   :  { %1304 = vmatprep.subr.bf16.mxu0 %v2396_v36  ;;  %1476 = vmatprep.subr.bf16.mxu1 %v2398_v37  ;;  %v80_v36 = vpack.c.bf16 %v73_v33, %v66_v32  ;;  %v2482_v37 = vld [vmem:[#allocation5 + $0x2e4] ss:$16 sps:$4 sm:$0xff]   ;;  %v2563_v32 = vld [vmem:[#allocation5 + $0x48c] ss:$16 sps:$4 sm:$0xff]   ;;  %v2558_v33 = vld [vmem:[#allocation5 + $0x480] ss:$16 sps:$4 sm:$0xff]  }
  0x5e   :  { %1305 = vmatpush1.bf16.msra.mxu0 %v2400_v38  ;;  %1477 = vmatpush1.bf16.msra.mxu1 %v2401_v39  ;;  %v2485_v38 = vld [vmem:[#allocation5 + $0x2ec] ss:$16 sps:$4 sm:$0xff]   ;;  %v2480_v39 = vld [vmem:[#allocation5 + $0x2e0] ss:$16 sps:$4 sm:$0xff]  }
  0x5f   :  { %1306 = vmatprep.subr.bf16.mxu0 %v2402_v40  ;;  %1478 = vmatprep.subr.bf16.mxu1 %v2404_v41  ;;  %v2483_v40 = vld [vmem:[#allocation5 + $0x2e8] ss:$16 sps:$4 sm:$0xff]   ;;  %v2488_v41 = vld [vmem:[#allocation5 + $0x304] ss:$16 sps:$4 sm:$0xff]  }
  0x62   :  { %1307 = vmatpush1.bf16.msra.mxu0 %v2406_v42  ;;  %1479 = vmatpush1.bf16.msra.mxu1 %v2407_v43  ;;  %v2491_v42 = vld [vmem:[#allocation5 + $0x30c] ss:$16 sps:$4 sm:$0xff]   ;;  %v2486_v43 = vld [vmem:[#allocation5 + $0x300] ss:$16 sps:$4 sm:$0xff]  }
  0x63   :  { %1308 = vmatprep.subr.bf16.mxu0 %v2408_v44  ;;  %1480 = vmatprep.subr.bf16.mxu1 %v2410_v45  ;;  %v2489_v44 = vld [vmem:[#allocation5 + $0x308] ss:$16 sps:$4 sm:$0xff]   ;;  %v2494_v45 = vld [vmem:[#allocation5 + $0x324] ss:$16 sps:$4 sm:$0xff]  }
  0x66   :  { %1309 = vmatpush1.bf16.msra.mxu0 %v2412_v48  ;;  %1481 = vmatpush1.bf16.msra.mxu1 %v2413_v49  ;;  %v2495_v48 = vld [vmem:[#allocation5 + $0x328] ss:$16 sps:$4 sm:$0xff]   ;;  %v2500_v49 = vld [vmem:[#allocation5 + $0x344] ss:$16 sps:$4 sm:$0xff]  }
  0x67   :  { %1310 = vmatprep.subr.bf16.mxu0 %v2414_v51  ;;  %1482 = vmatprep.subr.bf16.mxu1 %v2416_v52  ;;  %v2498_v51 = vld [vmem:[#allocation5 + $0x340] ss:$16 sps:$4 sm:$0xff]   ;;  %v2501_v52 = vld [vmem:[#allocation5 + $0x348] ss:$16 sps:$4 sm:$0xff]  }
  0x6a   :  { %1311 = vmatpush1.bf16.msra.mxu0 %v2418_v53  ;;  %1483 = vmatpush1.bf16.msra.mxu1 %v2419_v54  ;;  %v2506_v53 = vld [vmem:[#allocation5 + $0x364] ss:$16 sps:$4 sm:$0xff]   ;;  %v2509_v54 = vld [vmem:[#allocation5 + $0x36c] ss:$16 sps:$4 sm:$0xff]  }
  0x6b   :  { %1312 = vmatprep.subr.bf16.mxu0 %v2420_v55  ;;  %1484 = vmatprep.subr.bf16.mxu1 %v2422_v56  ;;  %v2504_v55 = vld [vmem:[#allocation5 + $0x360] ss:$16 sps:$4 sm:$0xff]   ;;  %v2507_v56 = vld [vmem:[#allocation5 + $0x368] ss:$16 sps:$4 sm:$0xff]  }
  0x6e   :  { %1313 = vmatpush1.bf16.msra.mxu0 %v2424_v57  ;;  %1485 = vmatpush1.bf16.msra.mxu1 %v2425_v58  ;;  %v2512_v57 = vld [vmem:[#allocation5 + $0x384] ss:$16 sps:$4 sm:$0xff]   ;;  %v2515_v58 = vld [vmem:[#allocation5 + $0x38c] ss:$16 sps:$4 sm:$0xff]  }
  0x6f   :  { %1314 = vmatprep.subr.bf16.mxu0 %v2426_v59  ;;  %1486 = vmatprep.subr.bf16.mxu1 %v2428_v60  ;;  %v2510_v59 = vld [vmem:[#allocation5 + $0x380] ss:$16 sps:$4 sm:$0xff]   ;;  %v2513_v60 = vld [vmem:[#allocation5 + $0x388] ss:$16 sps:$4 sm:$0xff]  }
  0x72   :  { %1315 = vmatpush1.bf16.msra.mxu0 %v2430_v61  ;;  %1487 = vmatpush1.bf16.msra.mxu1 %v2431_v62  ;;  %v2518_v61 = vld [vmem:[#allocation5 + $0x3a4] ss:$16 sps:$4 sm:$0xff]   ;;  %v2521_v62 = vld [vmem:[#allocation5 + $0x3ac] ss:$16 sps:$4 sm:$0xff]  }
  0x73   :  { %1316 = vmatprep.subr.bf16.mxu0 %v2432_v63  ;;  %1488 = vmatprep.subr.bf16.mxu1 %v2434_v0  ;;  %v2516_v63 = vld [vmem:[#allocation5 + $0x3a0] ss:$16 sps:$4 sm:$0xff]   ;;  %v2519_v0 = vld [vmem:[#allocation5 + $0x3a8] ss:$16 sps:$4 sm:$0xff]  }
  0x76   :  { %1317 = vmatpush1.bf16.msra.mxu0 %v2436_v1  ;;  %1489 = vmatpush1.bf16.msra.mxu1 %v2437_v2  ;;  %v2524_v1 = vld [vmem:[#allocation5 + $0x3c4] ss:$16 sps:$4 sm:$0xff]   ;;  %v2527_v2 = vld [vmem:[#allocation5 + $0x3cc] ss:$16 sps:$4 sm:$0xff]  }
  0x77   :  { %1329 = vmatprep.subr.bf16.mxu0 %v2440_v3  ;;  %1501 = vmatprep.subr.bf16.mxu1 %v2443_v6  ;;  %v2522_v3 = vld [vmem:[#allocation5 + $0x3c0] ss:$16 sps:$4 sm:$0xff]   ;;  %v2533_v6 = vld [vmem:[#allocation5 + $0x3ec] ss:$16 sps:$4 sm:$0xff]  }
  0x79   :  { %1319 = vmatmul.mubr.bf16.vlgmr.msra.gmra.mrb[0].mxu0 %v77_v9  ;;  %1491 = vmatmul.mubr.bf16.vlgmr.msra.gmra.mrb[0].mxu1 %v77_v9  ;;  %v2536_v9 = vld [vmem:[#allocation5 + $0x404] ss:$16 sps:$4 sm:$0xff]  }
  0x7a   :  { %1330 = vmatpush1.bf16.msra.mxu0 %v2438_v7  ;;  %1502 = vmatpush1.bf16.msra.mxu1 %v2441_v8  ;;  %v2528_v7 = vld [vmem:[#allocation5 + $0x3e0] ss:$16 sps:$4 sm:$0xff]   ;;  %v2531_v8 = vld [vmem:[#allocation5 + $0x3e8] ss:$16 sps:$4 sm:$0xff]  }
  0x7b   :  { %1331 = vmatprep.subr.bf16.mxu0 %v2446_v10  ;;  %1503 = vmatprep.subr.bf16.mxu1 %v2449_v11  ;;  %v65_v10 = vld [vmem:[#allocation2 + $0x10] sm:$0xff]  ;;  %v72_v11 = vld [vmem:[#allocation2 + $0x48] sm:$0xff] }
  0x7c   :  { %1361 = vmatprep.mubr.bf16.mxu0 %v80_v36  ;;  %1533 = vmatprep.mubr.bf16.mxu1 %v80_v36  ;;  %v2569_v36 = vld [vmem:[#allocation5 + $0x4ac] ss:$16 sps:$4 sm:$0xff]  }
  0x7e   :  { %1332 = vmatpush1.bf16.msra.mxu0 %v2444_v12  ;;  %1504 = vmatpush1.bf16.msra.mxu1 %v2447_v13  ;;  %v2539_v12 = vld [vmem:[#allocation5 + $0x40c] ss:$16 sps:$4 sm:$0xff]   ;;  %v2534_v13 = vld [vmem:[#allocation5 + $0x400] ss:$16 sps:$4 sm:$0xff]  }
  0x7f   :  { %1333 = vmatprep.subr.bf16.mxu0 %v2452_v14  ;;  %1505 = vmatprep.subr.bf16.mxu1 %v2455_v15  ;;  %v2537_v14 = vld [vmem:[#allocation5 + $0x408] ss:$16 sps:$4 sm:$0xff]   ;;  %v79_v15 = vpack.c.bf16 %v72_v11, %v65_v10  ;;  %v2626_v11 = vld [vmem:[#allocation5 + $0x5e4] ss:$16 sps:$4 sm:$0xff]  }
  0x80   :  { %v2621_v10 = vld [vmem:[#allocation5 + $0x5c8] ss:$16 sps:$4 sm:$0xff]  }
  0x82   :  { %1334 = vmatpush1.bf16.msra.mxu0 %v2450_v16  ;;  %1506 = vmatpush1.bf16.msra.mxu1 %v2453_v17  ;;  %v2542_v16 = vld [vmem:[#allocation5 + $0x424] ss:$16 sps:$4 sm:$0xff]   ;;  %v2545_v17 = vld [vmem:[#allocation5 + $0x42c] ss:$16 sps:$4 sm:$0xff]  }
  0x83   :  { %1335 = vmatprep.subr.bf16.mxu0 %v2458_v18  ;;  %1507 = vmatprep.subr.bf16.mxu1 %v2461_v19  ;;  %v68_v18 = vld [vmem:[#allocation2 + $0x28] sm:$0xff]  ;;  %v2540_v19 = vld [vmem:[#allocation5 + $0x420] ss:$16 sps:$4 sm:$0xff]  }
  0x86   :  { %1336 = vmatpush1.bf16.msra.mxu0 %v2456_v20  ;;  %1508 = vmatpush1.bf16.msra.mxu1 %v2459_v21  ;;  %v2543_v20 = vld [vmem:[#allocation5 + $0x428] ss:$16 sps:$4 sm:$0xff]   ;;  %v75_v21 = vld [vmem:[#allocation2 + $0x60] sm:$0xff] }
  0x87   :  { %1337 = vmatprep.subr.bf16.mxu0 %v2464_v22  ;;  %1509 = vmatprep.subr.bf16.mxu1 %v2467_v23  ;;  %v2548_v22 = vld [vmem:[#allocation5 + $0x444] ss:$16 sps:$4 sm:$0xff]   ;;  %v82_v23 = vpack.c.bf16 %v75_v21, %v68_v18  ;;  %v2635_v18 = vld [vmem:[#allocation5 + $0x60c] ss:$16 sps:$4 sm:$0xff]   ;;  %v2633_v21 = vld [vmem:[#allocation5 + $0x608] ss:$16 sps:$4 sm:$0xff]  }
  0x8a   :  { %1338 = vmatpush1.bf16.msra.mxu0 %v2462_v24  ;;  %1510 = vmatpush1.bf16.msra.mxu1 %v2465_v25  ;;  %v2551_v24 = vld [vmem:[#allocation5 + $0x44c] ss:$16 sps:$4 sm:$0xff]   ;;  %v2546_v25 = vld [vmem:[#allocation5 + $0x440] ss:$16 sps:$4 sm:$0xff]  }
  0x8b   :  { %1339 = vmatprep.subr.bf16.mxu0 %v2470_v26  ;;  %1511 = vmatprep.subr.bf16.mxu1 %v2473_v27  ;;  %v2549_v26 = vld [vmem:[#allocation5 + $0x448] ss:$16 sps:$4 sm:$0xff]   ;;  %v2554_v27 = vld [vmem:[#allocation5 + $0x464] ss:$16 sps:$4 sm:$0xff]  }
  0x8e   :  { %1340 = vmatpush1.bf16.msra.mxu0 %v2468_v28  ;;  %1512 = vmatpush1.bf16.msra.mxu1 %v2471_v29  ;;  %v2557_v28 = vld [vmem:[#allocation5 + $0x46c] ss:$16 sps:$4 sm:$0xff]   ;;  %v2552_v29 = vld [vmem:[#allocation5 + $0x460] ss:$16 sps:$4 sm:$0xff]  }
  0x8f   :  { %1341 = vmatprep.subr.bf16.mxu0 %v2476_v30  ;;  %1513 = vmatprep.subr.bf16.mxu1 %v2479_v31  ;;  %v2555_v30 = vld [vmem:[#allocation5 + $0x468] ss:$16 sps:$4 sm:$0xff]   ;;  %v2560_v31 = vld [vmem:[#allocation5 + $0x484] ss:$16 sps:$4 sm:$0xff]  }
  0x92   :  { %1342 = vmatpush1.bf16.msra.mxu0 %v2474_v34  ;;  %1514 = vmatpush1.bf16.msra.mxu1 %v2477_v35  ;;  %v2561_v34 = vld [vmem:[#allocation5 + $0x488] ss:$16 sps:$4 sm:$0xff]   ;;  %v2566_v35 = vld [vmem:[#allocation5 + $0x4a4] ss:$16 sps:$4 sm:$0xff]  }
  0x93   :  { %1343 = vmatprep.subr.bf16.mxu0 %v2482_v37  ;;  %1515 = vmatprep.subr.bf16.mxu1 %v2485_v38  ;;  %v2564_v37 = vld [vmem:[#allocation5 + $0x4a0] ss:$16 sps:$4 sm:$0xff]   ;;  %v2567_v38 = vld [vmem:[#allocation5 + $0x4a8] ss:$16 sps:$4 sm:$0xff]  }
  0x96   :  { %1344 = vmatpush1.bf16.msra.mxu0 %v2480_v39  ;;  %1516 = vmatpush1.bf16.msra.mxu1 %v2483_v40  ;;  %v2572_v39 = vld [vmem:[#allocation5 + $0x4c4] ss:$16 sps:$4 sm:$0xff]   ;;  %v2575_v40 = vld [vmem:[#allocation5 + $0x4cc] ss:$16 sps:$4 sm:$0xff]  }
  0x97   :  { %1345 = vmatprep.subr.bf16.mxu0 %v2488_v41  ;;  %1517 = vmatprep.subr.bf16.mxu1 %v2491_v42  ;;  %v2570_v41 = vld [vmem:[#allocation5 + $0x4c0] ss:$16 sps:$4 sm:$0xff]   ;;  %v2573_v42 = vld [vmem:[#allocation5 + $0x4c8] ss:$16 sps:$4 sm:$0xff]  }
  0x9a   :  { %1346 = vmatpush1.bf16.msra.mxu0 %v2486_v43  ;;  %1518 = vmatpush1.bf16.msra.mxu1 %v2489_v44  ;;  %v2578_v43 = vld [vmem:[#allocation5 + $0x4e4] ss:$16 sps:$4 sm:$0xff]   ;;  %v2581_v44 = vld [vmem:[#allocation5 + $0x4ec] ss:$16 sps:$4 sm:$0xff]  }
  0x9b   :  { %1347 = vmatprep.subr.bf16.mxu0 %v2494_v45  ;;  %1519 = vmatprep.subr.bf16.mxu1 %v2497_v46  ;;  %v2576_v45 = vld [vmem:[#allocation5 + $0x4e0] ss:$16 sps:$4 sm:$0xff]   ;;  %v2579_v46 = vld [vmem:[#allocation5 + $0x4e8] ss:$16 sps:$4 sm:$0xff]  }
  0x9e   :  { %1348 = vmatpush1.bf16.msra.mxu0 %v2492_v47  ;;  %1520 = vmatpush1.bf16.msra.mxu1 %v2495_v48  ;;  %v2584_v47 = vld [vmem:[#allocation5 + $0x504] ss:$16 sps:$4 sm:$0xff]   ;;  %v2587_v48 = vld [vmem:[#allocation5 + $0x50c] ss:$16 sps:$4 sm:$0xff]  }
  0x9f   :  { %1349 = vmatprep.subr.bf16.mxu0 %v2500_v49  ;;  %1521 = vmatprep.subr.bf16.mxu1 %v2503_v50  ;;  %v2582_v49 = vld [vmem:[#allocation5 + $0x500] ss:$16 sps:$4 sm:$0xff]   ;;  %v2585_v50 = vld [vmem:[#allocation5 + $0x508] ss:$16 sps:$4 sm:$0xff]  }
  0xa2   :  { %1350 = vmatpush1.bf16.msra.mxu0 %v2498_v51  ;;  %1522 = vmatpush1.bf16.msra.mxu1 %v2501_v52  ;;  %v2590_v51 = vld [vmem:[#allocation5 + $0x524] ss:$16 sps:$4 sm:$0xff]   ;;  %v2593_v52 = vld [vmem:[#allocation5 + $0x52c] ss:$16 sps:$4 sm:$0xff]  }
  0xa3   :  { %1351 = vmatprep.subr.bf16.mxu0 %v2506_v53  ;;  %1523 = vmatprep.subr.bf16.mxu1 %v2509_v54  ;;  %v2588_v53 = vld [vmem:[#allocation5 + $0x520] ss:$16 sps:$4 sm:$0xff]   ;;  %v2591_v54 = vld [vmem:[#allocation5 + $0x528] ss:$16 sps:$4 sm:$0xff]  }
  0xa6   :  { %1352 = vmatpush1.bf16.msra.mxu0 %v2504_v55  ;;  %1524 = vmatpush1.bf16.msra.mxu1 %v2507_v56  ;;  %v2596_v55 = vld [vmem:[#allocation5 + $0x544] ss:$16 sps:$4 sm:$0xff]   ;;  %v2599_v56 = vld [vmem:[#allocation5 + $0x54c] ss:$16 sps:$4 sm:$0xff]  }
  0xa7   :  { %1353 = vmatprep.subr.bf16.mxu0 %v2512_v57  ;;  %1525 = vmatprep.subr.bf16.mxu1 %v2515_v58  ;;  %v2594_v57 = vld [vmem:[#allocation5 + $0x540] ss:$16 sps:$4 sm:$0xff]   ;;  %v2597_v58 = vld [vmem:[#allocation5 + $0x548] ss:$16 sps:$4 sm:$0xff]  }
  0xaa   :  { %1354 = vmatpush1.bf16.msra.mxu0 %v2510_v59  ;;  %1526 = vmatpush1.bf16.msra.mxu1 %v2513_v60  ;;  %v2602_v59 = vld [vmem:[#allocation5 + $0x564] ss:$16 sps:$4 sm:$0xff]   ;;  %v2605_v60 = vld [vmem:[#allocation5 + $0x56c] ss:$16 sps:$4 sm:$0xff]  }
  0xab   :  { %1355 = vmatprep.subr.bf16.mxu0 %v2518_v61  ;;  %1527 = vmatprep.subr.bf16.mxu1 %v2521_v62  ;;  %v2600_v61 = vld [vmem:[#allocation5 + $0x560] ss:$16 sps:$4 sm:$0xff]   ;;  %v2603_v62 = vld [vmem:[#allocation5 + $0x568] ss:$16 sps:$4 sm:$0xff]  }
  0xae   :  { %1356 = vmatpush1.bf16.msra.mxu0 %v2516_v63  ;;  %1528 = vmatpush1.bf16.msra.mxu1 %v2519_v0  ;;  %v2608_v63 = vld [vmem:[#allocation5 + $0x584] ss:$16 sps:$4 sm:$0xff]   ;;  %v2611_v0 = vld [vmem:[#allocation5 + $0x58c] ss:$16 sps:$4 sm:$0xff]  }
  0xaf   :  { %1357 = vmatprep.subr.bf16.mxu0 %v2524_v1  ;;  %1529 = vmatprep.subr.bf16.mxu1 %v2527_v2  ;;  %v2606_v1 = vld [vmem:[#allocation5 + $0x580] ss:$16 sps:$4 sm:$0xff]   ;;  %v2609_v2 = vld [vmem:[#allocation5 + $0x588] ss:$16 sps:$4 sm:$0xff]  }
  0xb2   :  { %1358 = vmatpush1.bf16.msra.mxu0 %v2522_v3  ;;  %1530 = vmatpush1.bf16.msra.mxu1 %v2525_v4  ;;  %v2614_v3 = vld [vmem:[#allocation5 + $0x5a4] ss:$16 sps:$4 sm:$0xff]   ;;  %v2617_v4 = vld [vmem:[#allocation5 + $0x5ac] ss:$16 sps:$4 sm:$0xff]  }
  0xb3   :  { %1359 = vmatprep.subr.bf16.mxu0 %v2530_v5  ;;  %1531 = vmatprep.subr.bf16.mxu1 %v2533_v6  ;;  %v2612_v5 = vld [vmem:[#allocation5 + $0x5a0] ss:$16 sps:$4 sm:$0xff]   ;;  %v2615_v6 = vld [vmem:[#allocation5 + $0x5a8] ss:$16 sps:$4 sm:$0xff]  }
  0xb6   :  { %1360 = vmatpush1.bf16.msra.mxu0 %v2528_v7  ;;  %1532 = vmatpush1.bf16.msra.mxu1 %v2531_v8  ;;  %v2620_v7 = vld [vmem:[#allocation5 + $0x5c4] ss:$16 sps:$4 sm:$0xff]   ;;  %v2623_v8 = vld [vmem:[#allocation5 + $0x5cc] ss:$16 sps:$4 sm:$0xff]  }
  0xb7   :  { %1372 = vmatprep.subr.bf16.mxu0 %v2536_v9  ;;  %1544 = vmatprep.subr.bf16.mxu1 %v2539_v12  ;;  %v2618_v9 = vld [vmem:[#allocation5 + $0x5c0] ss:$16 sps:$4 sm:$0xff]   ;;  %v2629_v12 = vld [vmem:[#allocation5 + $0x5ec] ss:$16 sps:$4 sm:$0xff]  }
  0xb9   :  { %1362 = vmatmul.mubr.bf16.vlgmr.msra.gmra.mrb[0].mxu0 %v79_v15  ;;  %1534 = vmatmul.mubr.bf16.vlgmr.msra.gmra.mrb[0].mxu1 %v79_v15  ;;  %v67_v15 = vld [vmem:[#allocation2 + $0x20] sm:$0xff] }
  0xba   :  { %1373 = vmatpush1.bf16.msra.mxu0 %v2534_v13  ;;  %1545 = vmatpush1.bf16.msra.mxu1 %v2537_v14  ;;  %v2624_v13 = vld [vmem:[#allocation5 + $0x5e0] ss:$16 sps:$4 sm:$0xff]   ;;  %v2627_v14 = vld [vmem:[#allocation5 + $0x5e8] ss:$16 sps:$4 sm:$0xff]  }
  0xbb   :  { %1374 = vmatprep.subr.bf16.mxu0 %v2542_v16  ;;  %1546 = vmatprep.subr.bf16.mxu1 %v2545_v17  ;;  %v74_v16 = vld [vmem:[#allocation2 + $0x58] sm:$0xff]  ;;  %v2632_v17 = vld [vmem:[#allocation5 + $0x604] ss:$16 sps:$4 sm:$0xff]  }
  0xbc   :  { %1404 = vmatprep.mubr.bf16.mxu0 %v82_v23  ;;  %1576 = vmatprep.mubr.bf16.mxu1 %v82_v23  ;;  %v2637_v23 = vld [vmem:[#allocation7 + $0xc0] sm:$0xff]  }
  0xbe   :  { %1375 = vmatpush1.bf16.msra.mxu0 %v2540_v19  ;;  %1547 = vmatpush1.bf16.msra.mxu1 %v2543_v20  ;;  %v81_v19 = vpack.c.bf16 %v74_v16, %v67_v15  ;;  %v2630_v20 = vld [vmem:[#allocation5 + $0x600] ss:$16 sps:$4 sm:$0xff]  }
  0xbf   :  { %1376 = vmatprep.subr.bf16.mxu0 %v2548_v22  ;;  %1548 = vmatprep.subr.bf16.mxu1 %v2551_v24  ;;  %v2636_v22 = vld [vmem:[#allocation7 + $0x40] sm:$0xff]   ;;  %v2771_v24 = vmov 0  }
  0xc2   :  { %1377 = vmatpush1.bf16.msra.mxu0 %v2546_v25  ;;  %1549 = vmatpush1.bf16.msra.mxu1 %v2549_v26  ;;  %v69_v25 = vld [vmem:[#allocation2 + $0x30] sm:$0xff]  ;;  %v76_v26 = vld [vmem:[#allocation2 + $0x68] sm:$0xff] }
  0xc3   :  { %1378 = vmatprep.subr.bf16.mxu0 %v2554_v27  ;;  %1550 = vmatprep.subr.bf16.mxu1 %v2557_v28  ;;  %v83_v27 = vpack.c.bf16 %v76_v26, %v69_v25  ;;  %v2638_v28 = vld [vmem:[#allocation7] sm:$0xff]  }
  0xc6   :  { %1379 = vmatpush1.bf16.msra.mxu0 %v2552_v29  ;;  %1551 = vmatpush1.bf16.msra.mxu1 %v2555_v30  ;;  %v2639_v29 = vld [vmem:[#allocation7 + $0x80] sm:$0xff]   ;;  %v2640_v30 = vld [vmem:[#allocation7 + $0x48] sm:$0xff]  }
  0xc7   :  { %1380 = vmatprep.subr.bf16.mxu0 %v2560_v31  ;;  %1552 = vmatprep.subr.bf16.mxu1 %v2563_v32  ;;  %v2641_v31 = vld [vmem:[#allocation7 + $0xc8] sm:$0xff]  }
  0xc8   :  { %v2642_v32 = vld [vmem:[#allocation7 + $0x8] sm:$0xff]  }
  0xca   :  { %1381 = vmatpush1.bf16.msra.mxu0 %v2558_v33  ;;  %1553 = vmatpush1.bf16.msra.mxu1 %v2561_v34  ;;  %v2643_v33 = vld [vmem:[#allocation7 + $0x88] sm:$0xff]   ;;  %v2644_v34 = vld [vmem:[#allocation7 + $0x50] sm:$0xff]  }
  0xcb   :  { %1382 = vmatprep.subr.bf16.mxu0 %v2566_v35  ;;  %1554 = vmatprep.subr.bf16.mxu1 %v2569_v36  ;;  %v2645_v35 = vld [vmem:[#allocation7 + $0xd0] sm:$0xff]  }
  0xcc   :  { %v2646_v36 = vld [vmem:[#allocation7 + $0x10] sm:$0xff]  }
  0xce   :  { %1383 = vmatpush1.bf16.msra.mxu0 %v2564_v37  ;;  %1555 = vmatpush1.bf16.msra.mxu1 %v2567_v38  ;;  %v2647_v37 = vld [vmem:[#allocation7 + $0x90] sm:$0xff]   ;;  %v2648_v38 = vld [vmem:[#allocation7 + $0x58] sm:$0xff]  }
  0xcf   :  { %1384 = vmatprep.subr.bf16.mxu0 %v2572_v39  ;;  %1556 = vmatprep.subr.bf16.mxu1 %v2575_v40  ;;  %v2649_v39 = vld [vmem:[#allocation7 + $0xd8] sm:$0xff]  }
  0xd0   :  { %v2650_v40 = vld [vmem:[#allocation7 + $0x18] sm:$0xff]  }
  0xd2   :  { %1385 = vmatpush1.bf16.msra.mxu0 %v2570_v41  ;;  %1557 = vmatpush1.bf16.msra.mxu1 %v2573_v42  ;;  %v2651_v41 = vld [vmem:[#allocation7 + $0x98] sm:$0xff]   ;;  %v2652_v42 = vld [vmem:[#allocation7 + $0x60] sm:$0xff]  }
  0xd3   :  { %1386 = vmatprep.subr.bf16.mxu0 %v2578_v43  ;;  %1558 = vmatprep.subr.bf16.mxu1 %v2581_v44  ;;  %v2653_v43 = vld [vmem:[#allocation7 + $0xe0] sm:$0xff]  }
  0xd4   :  { %v2654_v44 = vld [vmem:[#allocation7 + $0x20] sm:$0xff]  }
  0xd6   :  { %1387 = vmatpush1.bf16.msra.mxu0 %v2576_v45  ;;  %1559 = vmatpush1.bf16.msra.mxu1 %v2579_v46  ;;  %v2655_v45 = vld [vmem:[#allocation7 + $0xa0] sm:$0xff]   ;;  %v2656_v46 = vld [vmem:[#allocation7 + $0x68] sm:$0xff]  }
  0xd7   :  { %1388 = vmatprep.subr.bf16.mxu0 %v2584_v47  ;;  %1560 = vmatprep.subr.bf16.mxu1 %v2587_v48  ;;  %v2657_v47 = vld [vmem:[#allocation7 + $0xe8] sm:$0xff]  }
  0xd8   :  { %v2658_v48 = vld [vmem:[#allocation7 + $0x28] sm:$0xff]  }
  0xda   :  { %1389 = vmatpush1.bf16.msra.mxu0 %v2582_v49  ;;  %1561 = vmatpush1.bf16.msra.mxu1 %v2585_v50  ;;  %v2659_v49 = vld [vmem:[#allocation7 + $0xa8] sm:$0xff]   ;;  %v2660_v50 = vld [vmem:[#allocation7 + $0x70] sm:$0xff]  }
  0xdb   :  { %1390 = vmatprep.subr.bf16.mxu0 %v2590_v51  ;;  %1562 = vmatprep.subr.bf16.mxu1 %v2593_v52  ;;  %v2661_v51 = vld [vmem:[#allocation7 + $0xf0] sm:$0xff]  }
  0xdc   :  { %v2662_v52 = vld [vmem:[#allocation7 + $0x30] sm:$0xff]  }
  0xde   :  { %1391 = vmatpush1.bf16.msra.mxu0 %v2588_v53  ;;  %1563 = vmatpush1.bf16.msra.mxu1 %v2591_v54  ;;  %v2663_v53 = vld [vmem:[#allocation7 + $0xb0] sm:$0xff]   ;;  %v2664_v54 = vld [vmem:[#allocation7 + $0x78] sm:$0xff]  }
  0xdf   :  { %1392 = vmatprep.subr.bf16.mxu0 %v2596_v55  ;;  %1564 = vmatprep.subr.bf16.mxu1 %v2599_v56  ;;  %v2665_v55 = vld [vmem:[#allocation7 + $0xf8] sm:$0xff]  }
  0xe0   :  { %v2666_v56 = vld [vmem:[#allocation7 + $0x38] sm:$0xff]  }
  0xe2   :  { %1393 = vmatpush1.bf16.msra.mxu0 %v2594_v57  ;;  %1565 = vmatpush1.bf16.msra.mxu1 %v2597_v58  ;;  %v2667_v57 = vld [vmem:[#allocation7 + $0xb8] sm:$0xff]   ;;  %v282_v58 = vlaneseq }
  0xe3   :  { %1394 = vmatprep.subr.bf16.mxu0 %v2602_v59  ;;  %1566 = vmatprep.subr.bf16.mxu1 %v2605_v60 }
  0xe4   :  { %v283_v59 = vshrl.u32 %v282_v58, 7 }
  0xe6   :  { %1395 = vmatpush1.bf16.msra.mxu0 %v2600_v61  ;;  %1567 = vmatpush1.bf16.msra.mxu1 %v2603_v62  ;;  %v284_v60 = vsub.s32 0, %v283_v59  ;;  %v292_v61 = vsub.s32 2, %v283_v59  ;;  %v280_v62 = vld [vmem:[%s2865_s2] sm:$0xf] }
  0xe7   :  { %1396 = vmatprep.subr.bf16.mxu0 %v2608_v63  ;;  %1568 = vmatprep.subr.bf16.mxu1 %v2611_v0  ;;  %v288_v63 = vsub.s32 1, %v283_v59  ;;  %v296_v0 = vsub.s32 3, %v283_v59 }
  0xea   :  { %1397 = vmatpush1.bf16.msra.mxu0 %v2606_v1  ;;  %1569 = vmatpush1.bf16.msra.mxu1 %v2609_v2  ;;  %v285_v1 = vrot.slane %v280_v62, %v284_v60  ;;  %v293_v2 = vrot.slane %v280_v62, %v292_v61 }
  0xeb   :  { %1398 = vmatprep.subr.bf16.mxu0 %v2614_v3  ;;  %1570 = vmatprep.subr.bf16.mxu1 %v2617_v4  ;;  %v289_v3 = vrot.slane %v280_v62, %v288_v63  ;;  %v297_v4 = vrot.slane %v280_v62, %v296_v0 }
  0xee   :  { %1399 = vmatpush1.bf16.msra.mxu0 %v2612_v5  ;;  %1571 = vmatpush1.bf16.msra.mxu1 %v2615_v6 }
  0xef   :  { %1400 = vmatprep.subr.bf16.mxu0 %v2620_v7  ;;  %1572 = vmatprep.subr.bf16.mxu1 %v2623_v8 }
  0xf2   :  { %1401 = vmatpush1.bf16.msra.mxu0 %v2618_v9  ;;  %1573 = vmatpush1.bf16.msra.mxu1 %v2621_v10 }
  0xf3   :  { %1402 = vmatprep.subr.bf16.mxu0 %v2626_v11  ;;  %1574 = vmatprep.subr.bf16.mxu1 %v2629_v12 }
  0xf6   :  { %1403 = vmatpush1.bf16.msra.mxu0 %v2624_v13  ;;  %1575 = vmatpush1.bf16.msra.mxu1 %v2627_v14 }
  0xf7   :  { %1415 = vmatprep.subr.bf16.mxu0 %v2632_v17  ;;  %1587 = vmatprep.subr.bf16.mxu1 %v2635_v18 }
  0xf9   :  { %1405 = vmatmul.mubr.bf16.vlgmr.msra.gmra.mrb[0].mxu0 %v81_v19  ;;  %1577 = vmatmul.mubr.bf16.vlgmr.msra.gmra.mrb[0].mxu1 %v81_v19 }
  0xfa   :  { %1416 = vmatpush1.bf16.msra.mxu0 %v2630_v20  ;;  %1588 = vmatpush1.bf16.msra.mxu1 %v2633_v21 }
  0xfb   :  { %1447 = vmatprep.mubr.bf16.mxu0 %v2771_v24  ;;  %1619 = vmatprep.mubr.bf16.mxu1 %v2771_v24 }
  0xfc   :  { %2255 = vmatprep.subr.bf16.mxu0 %v2636_v22  ;;  %2277 = vmatprep.subr.bf16.mxu1 %v2637_v23 }
 0x105   :  { %2211 = vmatmul.mubr.msk.bf16.vlgmr.msra.gmra.mrb[0].mxu0 %vm1282_vm0, %v83_v27  ;;  %2212 = vmatmul.mubr.msk.bf16.vlgmr.msra.gmra.mrb[0].mxu1 %vm1282_vm0, %v83_v27 }
 0x106   :  { %2256 = vmatpush3.bf16.msra.mxu0 %v2638_v28  ;;  %2278 = vmatpush3.bf16.msra.mxu1 %v2639_v29 }
 0x107   :  { %2257 = vmatprep.subr.bf16.mxu0 %v2640_v30  ;;  %2279 = vmatprep.subr.bf16.mxu1 %v2641_v31 }
 0x10a   :  { %2258 = vmatpush3.bf16.msra.mxu0 %v2642_v32  ;;  %2280 = vmatpush3.bf16.msra.mxu1 %v2643_v33 }
 0x10b   :  { %2259 = vmatprep.subr.bf16.mxu0 %v2644_v34  ;;  %2281 = vmatprep.subr.bf16.mxu1 %v2645_v35  ;;  %v2213_v35 = vld [vmem:[%s2867_s4] ss:$0 sm:$0xff]  ;;  %s2734_s4 = scalar_lea.vmem %s2003_s11, 128 }
 0x10c   :  { %p2735_p10 = scmp.ne.s32.totalorder %s2003_s11, %s2734_s4  ;;  %p2740_p12 = scmp.lt.s32.totalorder %s2734_s4, %s2734_s4 }
 0x10e   :  { %2260 = vmatpush3.bf16.msra.mxu0 %v2646_v36  ;;  %2282 = vmatpush3.bf16.msra.mxu1 %v2647_v37  ;;  %p2741_p13 = por %p2740_p12, %p2739_p11 }
 0x10f   :  { %2261 = vmatprep.subr.bf16.mxu0 %v2648_v38  ;;  %2283 = vmatprep.subr.bf16.mxu1 %v2649_v39 }
 0x110   :  { %p2742_p0 = pnand %p2741_p13, %p2735_p10 }
 0x112   :  { %2262 = vmatpush3.bf16.msra.mxu0 %v2650_v40  ;;  %2284 = vmatpush3.bf16.msra.mxu1 %v2651_v41 }
 0x113   :  { %2263 = vmatprep.subr.bf16.mxu0 %v2652_v42  ;;  %2285 = vmatprep.subr.bf16.mxu1 %v2653_v43 }
 0x116   :  { %2264 = vmatpush3.bf16.msra.mxu0 %v2654_v44  ;;  %2286 = vmatpush3.bf16.msra.mxu1 %v2655_v45 }
 0x117   :  { %2265 = vmatprep.subr.bf16.mxu0 %v2656_v46  ;;  %2287 = vmatprep.subr.bf16.mxu1 %v2657_v47 }
 0x11a   :  { %2266 = vmatpush3.bf16.msra.mxu0 %v2658_v48  ;;  %2288 = vmatpush3.bf16.msra.mxu1 %v2659_v49 }
 0x11b   :  { %2267 = vmatprep.subr.bf16.mxu0 %v2660_v50  ;;  %2289 = vmatprep.subr.bf16.mxu1 %v2661_v51 }
 0x11e   :  { %2268 = vmatpush3.bf16.msra.mxu0 %v2662_v52  ;;  %2290 = vmatpush3.bf16.msra.mxu1 %v2663_v53 }
 0x11f   :  { %2269 = vmatprep.subr.bf16.mxu0 %v2664_v54  ;;  %2291 = vmatprep.subr.bf16.mxu1 %v2665_v55 }
 0x122   :  { %2270 = vmatpush3.bf16.msra.mxu0 %v2666_v56  ;;  %2292 = vmatpush3.bf16.msra.mxu1 %v2667_v57 }
 0x1d8   :  { %v1449_v5 = vpop.f32.mrb[0].mxu0  ;;  %v1621_v6 = vpop.f32.mrb[0].mxu1 }
 0x1d9   :  { %v2299_v7 = vadd.f32 %v1449_v5, %v285_v1  ;;  %v2303_v8 = vadd.f32 %v1621_v6, %v293_v2  ;;  %v1451_v9 = vpop.f32.mrb[1].mxu0  ;;  %v1623_v10 = vpop.f32.mrb[1].mxu1 }
 0x1da   :  { %v2300_v11 = vadd.f32 %v1451_v9, %v289_v3  ;;  %v2304_v12 = vadd.f32 %v1623_v10, %v297_v4  ;;  %v1453_v13 = vpop.f32.mrb[2].mxu0  ;;  %v1625_v14 = vpop.f32.mrb[2].mxu1 }
 0x1db   :  { %v2301_v15 = vadd.f32 %v1453_v13, %v285_v1  ;;  %v2305_v16 = vadd.f32 %v1625_v14, %v293_v2  ;;  %v1455_v17 = vpop.f32.mrb[3].mxu0  ;;  %v1627_v18 = vpop.f32.mrb[3].mxu1  ;;  %v1630_v21 = vmax.f32 %v2299_v7, 0.0  ;;  %v1632_v22 = vmax.f32 %v2303_v8, 0.0 }
 0x1dc   :  { %v2302_v19 = vadd.f32 %v1455_v17, %v289_v3  ;;  %v2306_v20 = vadd.f32 %v1627_v18, %v297_v4  ;;  %v1631_v25 = vmax.f32 %v2300_v11, 0.0  ;;  %v1633_v26 = vmax.f32 %v2304_v12, 0.0 }
 0x1dd   :  { %v1634_v23 = vmax.f32 %v2301_v15, 0.0  ;;  %v1636_v24 = vmax.f32 %v2305_v16, 0.0 }
 0x1de   :  { %v1635_v27 = vmax.f32 %v2302_v19, 0.0  ;;  %v1637_v28 = vmax.f32 %v2306_v20, 0.0 }
 0x1df   :  { %v1638_v29 = vpack.c.bf16 %v1634_v23, %v1630_v21  ;;  %v1640_v30 = vpack.c.bf16 %v1636_v24, %v1632_v22 }
 0x1e0   :  { %v1639_v31 = vpack.c.bf16 %v1635_v27, %v1631_v25  ;;  %v1641_v32 = vpack.c.bf16 %v1637_v28, %v1633_v26 }
 0x1e2   :  { %1937 = vmatprep.mubr.bf16.mxu0 %v1639_v31  ;;  %1978 = vmatprep.mubr.bf16.mxu1 %v1641_v32 }
 0x1e3   :  { %1938 = vmatmul.mubr.bf16.vlgmr.msra.gmra.mrb[4].mxu0 %v1638_v29  ;;  %1979 = vmatmul.mubr.bf16.vlgmr.msra.gmra.mrb[4].mxu1 %v1640_v30 }
 0x2b6   :  { %v2271_v33 = vpop.f32.mrb[4].mxu0  ;;  %v2293_v34 = vpop.f32.mrb[4].mxu1 }
 0x2b7   :  { %v2272_v36 = vpop.f32.mrb[5].mxu0  ;;  %v2294_v37 = vpop.f32.mrb[5].mxu1 }
 0x2b8   :  { %v2273_v38 = vadd.f32 %v2272_v36, %v2271_v33  ;;  %v2295_v39 = vadd.f32 %v2294_v37, %v2293_v34  ;;  %v2274_v40 = vpop.f32.mrb[6].mxu0  ;;  %v2296_v41 = vpop.f32.mrb[6].mxu1 }
 0x2b9   :  { %v2275_v42 = vpop.f32.mrb[7].mxu0  ;;  %v2297_v43 = vpop.f32.mrb[7].mxu1 }
 0x2ba   :  { %v1940_v44 = vadd.f32 %v2273_v38, %v2213_v35  ;;  %v2276_v45 = vadd.f32 %v2275_v42, %v2274_v40  ;;  %v2298_v46 = vadd.f32 %v2297_v43, %v2296_v41 }
 0x2bc   :  { %v1981_v47 = vadd.f32 %v2295_v39, %v1940_v44  ;;  %v1943_v48 = vadd.f32 %v2276_v45, %v2213_v35 }
 0x2be   :  { %v1984_v49 = vadd.f32 %v2298_v46, %v1943_v48 }
 0x2c0   :  { %v2253_v50 = vpack.c.bf16 %v1984_v49, %v1981_v47 }
 0x2c2   :  { %2254 = vst [vmem:[#allocation8] sm:$0xff] %v2253_v50  }
 0x2c3   :  { %2745 = shalt.err (!%p2742_p0)
}
 0x2c4   :  { %s2746_s14 = scalar_lea.hbm %s2868_s5, 128 }
 0x2c5   :  { %p2747_p1 = scmp.ne.s32.totalorder %s2868_s5, %s2746_s14  ;;  %p2750_p2 = scmp.lt.u32.totalorder %s2746_s14, %s2868_s5 }
 0x2c7   :  { %p2752_p3 = pnand %p2750_p2, %p2747_p1 }
 0x2c9   :  { %2755 = shalt.err (!%p2752_p3)
}
 0x2ca   :  { %2008 = dma.vmem_to_hbm [thread:$0]  %s2003_s11, 128, %s2868_s5, [#allocation4], %s2769_s0, %s2769_s0, %s2770_s30  }
 0x2cb   :  { %2760 = dma.done.wait [#allocation4], 128  }
 0x2cc   :  { %2761 = vsyncadd [#allocation4], 4294967168 }
 0x2cd   :  { %2012 = vsyncpa [#allocation3], 1 }
 0x2ce   :  { %2013 = vsyncpa [#allocation6], 1 }
 0x2cf   :  { %2014 = vsyncpa [#allocation4], 1 }

</bundles_post_ra>
